<compile_context>
chip_gen: v6e
topology: v6e:2x2x1
jax: 0.10.0
libtpu: 0.0.40
codegen_flags: <defaults>
</compile_context>

<pallas_src>
import jax
import jax.numpy as jnp
from jax.experimental import pallas as pl
from jax.experimental.pallas import tpu as pltpu


def policy_kernel(x_ref, p_ref, out_ref):
    B, K = x_ref.shape            # (8, 4)
    hid = p_ref.shape[1]          # 128
    n_out = out_ref.shape[1]      # 2

    x = x_ref[...]                # (B, 4)   f32
    p = p_ref[...]                # (8, 128) f32 packed params:
                                  #   rows 0-3: w1, row 4: b1,
                                  #   row 5: b2 (lanes 0..n_out-1), rows 6-7: w2^T

    # fc1 + relu: K=4 is far too small for the MXU -> 4 unrolled VPU
    # broadcast-FMAs over one (B,128) vreg, bias folded into the accumulator.
    h = jnp.broadcast_to(p[4:5, :], (B, hid))
    for k in range(K):            # static Python loop, unrolled at trace time
        h = h + x[:, k:k + 1] * p[k:k + 1, :]
    h = jnp.maximum(h, 0.0)

    # fc2 on VPU + XLU (no MXU): logit_j = cross-lane-sum(h * w2^T[j]) + b2[j].
    l0 = jnp.sum(h * p[6:7, :], axis=1, keepdims=True)    # (B, 1)
    l1 = jnp.sum(h * p[7:8, :], axis=1, keepdims=True)    # (B, 1)
    col = jax.lax.broadcasted_iota(jnp.int32, (B, n_out), 1)
    logits = jnp.where(col == 0, l0, l1) + p[5:6, 0:n_out]  # (B, 2)

    # softmax over dim=0 (the batch axis), exactly as in the PyTorch module.
    m = jnp.max(logits, axis=0, keepdims=True)
    e = jnp.exp(logits - m)
    s = jnp.sum(e, axis=0, keepdims=True)
    inv = pl.reciprocal(s, approx=True)     # EUP seed (free bundle slot)
    inv = inv * (2.0 - s * inv)             # one Newton step -> ~f32 accuracy
    out_ref[...] = e * inv                  # (B, 2) store, no padding


def pack_params(w1, b1, w2, b2):
    """One-time parameter packing (run at init, NOT per policy call).

    Returns a single (4 + 2 + n_out, hid) = (8, 128) f32 operand:
      rows 0-3: w1, row 4: b1, row 5: b2 zero-padded to hid, rows 6-7: w2^T.
    """
    hid = w1.shape[1]
    n_out = w2.shape[1]
    p = jnp.zeros((4 + 2 + n_out, hid), jnp.float32)
    p = p.at[0:4, :].set(w1.astype(jnp.float32))
    p = p.at[4, :].set(b1.astype(jnp.float32))
    p = p.at[5, :n_out].set(b2.astype(jnp.float32))
    p = p.at[6:6 + n_out, :].set(w2.T.astype(jnp.float32))
    return p


def policy_forward(x, params, n_out=2):
    """x: (B, 4) f32, params: pack_params(...) output -> (B, n_out) probs."""
    B = x.shape[0]
    hid = params.shape[1]
    vmem = pl.BlockSpec(memory_space=pltpu.MemorySpace.VMEM)
    cost = pl.CostEstimate(
        flops=2 * B * (4 * hid + hid * n_out),
        transcendentals=B * n_out,
        bytes_accessed=x.size * 4 + params.size * 4 + B * n_out * 4,
    )
    return pl.pallas_call(
        policy_kernel,
        out_shape=jax.ShapeDtypeStruct((B, n_out), jnp.float32),
        in_specs=[vmem, vmem],
        out_specs=vmem,
        cost_estimate=cost,
    )(x, params)


if __name__ == "__main__":
    key = jax.random.PRNGKey(0)
    k1, k2, k3, k4, k5 = jax.random.split(key, 5)

    B, IN, HID, OUT = 8, 4, 128, 2

    # deterministic synthetic inputs / parameters (PyTorch-style uniform init)
    x = jax.random.normal(k1, (B, IN), dtype=jnp.float32)
    bound1 = 1.0 / (IN ** 0.5)
    w1 = jax.random.uniform(k2, (IN, HID), jnp.float32, -bound1, bound1)
    b1 = jax.random.uniform(k3, (HID,), jnp.float32, -bound1, bound1)
    bound2 = 1.0 / (HID ** 0.5)
    w2 = jax.random.uniform(k4, (HID, OUT), jnp.float32, -bound2, bound2)
    b2 = jax.random.uniform(k5, (OUT,), jnp.float32, -bound2, bound2)

    # Parameter packing happens ONCE here (init time), not in the per-call path.
    params = jax.block_until_ready(pack_params(w1, b1, w2, b2))

    out = policy_forward(x, params)
    jax.block_until_ready(out)

    # pure-JAX reference check (softmax over dim=0, as in the PyTorch module)
    h_ref = jnp.maximum(x @ w1 + b1[None, :], 0.0)
    logits_ref = h_ref @ w2 + b2[None, :]
    ref = jax.nn.softmax(logits_ref, axis=0)

    assert out.shape == (B, OUT)
    assert jnp.allclose(out, ref, atol=1e-4, rtol=1e-4), "mismatch vs reference"
    print("KERNEL_OK")
</pallas_src>

<mosaic_0001>
module attributes {stable_mosaic.version = 11 : i64} {
  func.func @policy_kernel(%arg0: memref<8x4xf32, #tpu.memory_space<vmem>>, %arg1: memref<8x128xf32, #tpu.memory_space<vmem>>, %arg2: memref<8x2xf32, #tpu.memory_space<vmem>>) attributes {dimension_semantics = [], scalar_prefetch = 0 : i64, scratch_operands = 0 : i64, tpu.core_type = #tpu.core_type<tc>} {
    %c0 = arith.constant 0 : index
    %c0_0 = arith.constant 0 : index
    %0 = vector.load %arg0[%c0, %c0_0] : memref<8x4xf32, #tpu.memory_space<vmem>>, vector<8x4xf32>
    %c0_1 = arith.constant 0 : index
    %c0_2 = arith.constant 0 : index
    %1 = vector.load %arg1[%c0_1, %c0_2] : memref<8x128xf32, #tpu.memory_space<vmem>>, vector<8x128xf32>
    %2 = vector.extract_strided_slice %1 {offsets = [4, 0], sizes = [1, 128], strides = [1, 1]} : vector<8x128xf32> to vector<1x128xf32>
    %3 = vector.shape_cast %2 : vector<1x128xf32> to vector<1x128xf32>
    %4 = vector.broadcast %3 : vector<1x128xf32> to vector<8x128xf32>
    %5 = vector.extract_strided_slice %0 {offsets = [0, 0], sizes = [8, 1], strides = [1, 1]} : vector<8x4xf32> to vector<8x1xf32>
    %6 = vector.extract_strided_slice %1 {offsets = [0, 0], sizes = [1, 128], strides = [1, 1]} : vector<8x128xf32> to vector<1x128xf32>
    %7 = vector.broadcast %5 : vector<8x1xf32> to vector<8x128xf32>
    %8 = vector.broadcast %6 : vector<1x128xf32> to vector<8x128xf32>
    %9 = arith.mulf %7, %8 : vector<8x128xf32>
    %10 = arith.addf %4, %9 : vector<8x128xf32>
    %11 = vector.extract_strided_slice %0 {offsets = [0, 1], sizes = [8, 1], strides = [1, 1]} : vector<8x4xf32> to vector<8x1xf32>
    %12 = vector.extract_strided_slice %1 {offsets = [1, 0], sizes = [1, 128], strides = [1, 1]} : vector<8x128xf32> to vector<1x128xf32>
    %13 = vector.broadcast %11 : vector<8x1xf32> to vector<8x128xf32>
    %14 = vector.broadcast %12 : vector<1x128xf32> to vector<8x128xf32>
    %15 = arith.mulf %13, %14 : vector<8x128xf32>
    %16 = arith.addf %10, %15 : vector<8x128xf32>
    %17 = vector.extract_strided_slice %0 {offsets = [0, 2], sizes = [8, 1], strides = [1, 1]} : vector<8x4xf32> to vector<8x1xf32>
    %18 = vector.extract_strided_slice %1 {offsets = [2, 0], sizes = [1, 128], strides = [1, 1]} : vector<8x128xf32> to vector<1x128xf32>
    %19 = vector.broadcast %17 : vector<8x1xf32> to vector<8x128xf32>
    %20 = vector.broadcast %18 : vector<1x128xf32> to vector<8x128xf32>
    %21 = arith.mulf %19, %20 : vector<8x128xf32>
    %22 = arith.addf %16, %21 : vector<8x128xf32>
    %23 = vector.extract_strided_slice %0 {offsets = [0, 3], sizes = [8, 1], strides = [1, 1]} : vector<8x4xf32> to vector<8x1xf32>
    %24 = vector.extract_strided_slice %1 {offsets = [3, 0], sizes = [1, 128], strides = [1, 1]} : vector<8x128xf32> to vector<1x128xf32>
    %25 = vector.broadcast %23 : vector<8x1xf32> to vector<8x128xf32>
    %26 = vector.broadcast %24 : vector<1x128xf32> to vector<8x128xf32>
    %27 = arith.mulf %25, %26 : vector<8x128xf32>
    %28 = arith.addf %22, %27 : vector<8x128xf32>
    %cst = arith.constant 0.000000e+00 : f32
    %29 = vector.broadcast %cst : f32 to vector<8x128xf32>
    %30 = arith.maximumf %28, %29 : vector<8x128xf32>
    %31 = vector.extract_strided_slice %1 {offsets = [6, 0], sizes = [1, 128], strides = [1, 1]} : vector<8x128xf32> to vector<1x128xf32>
    %32 = vector.broadcast %31 : vector<1x128xf32> to vector<8x128xf32>
    %33 = arith.mulf %30, %32 : vector<8x128xf32>
    %cst_3 = arith.constant dense<0.000000e+00> : vector<8xf32>
    %34 = vector.multi_reduction <add>, %33, %cst_3 [1] : vector<8x128xf32> to vector<8xf32>
    %35 = vector.shape_cast %34 : vector<8xf32> to vector<8x1xf32>
    %36 = vector.extract_strided_slice %1 {offsets = [7, 0], sizes = [1, 128], strides = [1, 1]} : vector<8x128xf32> to vector<1x128xf32>
    %37 = vector.broadcast %36 : vector<1x128xf32> to vector<8x128xf32>
    %38 = arith.mulf %30, %37 : vector<8x128xf32>
    %cst_4 = arith.constant dense<0.000000e+00> : vector<8xf32>
    %39 = vector.multi_reduction <add>, %38, %cst_4 [1] : vector<8x128xf32> to vector<8xf32>
    %40 = vector.shape_cast %39 : vector<8xf32> to vector<8x1xf32>
    %41 = tpu.iota {dimensions = array<i32: 1>} : vector<8x2xi32>
    %c0_i32 = arith.constant 0 : i32
    %42 = vector.broadcast %c0_i32 : i32 to vector<8x2xi32>
    %43 = arith.cmpi eq, %41, %42 : vector<8x2xi32>
    %44 = vector.shape_cast %35 : vector<8x1xf32> to vector<8x1xf32>
    %45 = vector.broadcast %44 : vector<8x1xf32> to vector<8x2xf32>
    %46 = vector.shape_cast %40 : vector<8x1xf32> to vector<8x1xf32>
    %47 = vector.broadcast %46 : vector<8x1xf32> to vector<8x2xf32>
    %48 = arith.select %43, %45, %47 : vector<8x2xi1>, vector<8x2xf32>
    %49 = vector.extract_strided_slice %1 {offsets = [5, 0], sizes = [1, 2], strides = [1, 1]} : vector<8x128xf32> to vector<1x2xf32>
    %50 = vector.broadcast %49 : vector<1x2xf32> to vector<8x2xf32>
    %51 = arith.addf %48, %50 : vector<8x2xf32>
    %cst_5 = arith.constant dense<0xFF800000> : vector<2xf32>
    %52 = vector.multi_reduction <maximumf>, %51, %cst_5 [0] : vector<8x2xf32> to vector<2xf32>
    %53 = vector.shape_cast %52 : vector<2xf32> to vector<1x2xf32>
    %54 = vector.broadcast %53 : vector<1x2xf32> to vector<8x2xf32>
    %55 = arith.subf %51, %54 : vector<8x2xf32>
    %56 = math.exp %55 : vector<8x2xf32>
    %cst_6 = arith.constant dense<0.000000e+00> : vector<2xf32>
    %57 = vector.multi_reduction <add>, %56, %cst_6 [0] : vector<8x2xf32> to vector<2xf32>
    %58 = vector.shape_cast %57 : vector<2xf32> to vector<1x2xf32>
    %59 = tpu.reciprocal %58 {approx = true} : vector<1x2xf32> -> vector<1x2xf32>
    %60 = arith.mulf %58, %59 : vector<1x2xf32>
    %cst_7 = arith.constant 2.000000e+00 : f32
    %61 = vector.broadcast %cst_7 : f32 to vector<1x2xf32>
    %62 = arith.subf %61, %60 : vector<1x2xf32>
    %63 = arith.mulf %59, %62 : vector<1x2xf32>
    %64 = vector.broadcast %63 : vector<1x2xf32> to vector<8x2xf32>
    %65 = arith.mulf %56, %64 : vector<8x2xf32>
    %c0_8 = arith.constant 0 : index
    %c0_9 = arith.constant 0 : index
    %66 = vector.load %arg2[%c0_8, %c0_9] : memref<8x2xf32, #tpu.memory_space<vmem>>, vector<8x2xf32>
    tpu.vector_store %arg2[%c0_8, %c0_9], %65 {strides = array<i32>} : memref<8x2xf32, #tpu.memory_space<vmem>>, vector<8x2xf32>,
    return
  }
}

</mosaic_0001>

<bundles_post_ra>
// kernel: tpu_custom_call.1
= control target key start
LH: loop header
LB: loop body
LE: loop exit
PB: predicated region body
PF: predicated region fallthrough
CT: control target
= control target key end

     0   :  { %v123_v0 = vmov 0   ;;  %v124_v2 = vmov 2   ;;  %v125_v3 = vmov 1   ;;  %v126_v4 = vmov 3   ;;  %s154_s0 = inlined_call_operand.vmem [shape: f32[8,4], index: 0, kind: input, shape index: {}]   ;;  %s155_s1 = inlined_call_operand.vmem [shape: f32[8,128], index: 1, kind: input, shape index: {}]   ;;  %s156_s2 = inlined_call_operand.vmem [shape: f32[8,2], index: 2, kind: output, shape index: {}]  }
   0x1   :  { %114 = vset.pattern.permute.xlu0 %v123_v0  ;;  %v11_v1 = vld [vmem:[%s154_s0] sm:$0xff]  ;;  %116 = vset.pattern.permute.xlu1 %v124_v2  ;;  %v13_v5 = vlaneseq  ;;  %vm82_vm1 = vcmask 15360  }
   0x2   :  { %19 = vperm.xlu0 %114, %v11_v1   ;;  %39 = vperm.xlu1 %116, %v11_v1   ;;  %v12_v8 = vld [vmem:[%s155_s1] sm:$0xff] }
   0x3   :  { %v14_v6 = vshrl.u32 %v13_v5, 7  ;;  %v74_v37 = vand.u32 127, %v13_v5 }
   0x5   :  { %v24_v7 = vsub.s32 0, %v14_v6  ;;  %v15_v9 = vsub.s32 4, %v14_v6  ;;  %v34_v11 = vsub.s32 1, %v14_v6  ;;  %v44_v13 = vsub.s32 2, %v14_v6 }
   0x6   :  { %115 = vset.pattern.permute.xlu0 %v125_v3  ;;  %117 = vset.pattern.permute.xlu1 %v126_v4  ;;  %v54_v15 = vsub.s32 3, %v14_v6  ;;  %v68_v25 = vsub.s32 7, %v14_v6  ;;  %v61_v29 = vsub.s32 6, %v14_v6  ;;  %v79_v38 = vsub.s32 5, %v14_v6 }
   0x7   :  { %29 = vperm.xlu0 %115, %v11_v1   ;;  %49 = vperm.xlu1 %117, %v11_v1   ;;  %v25_v10 = vrot.slane %v12_v8, %v24_v7  ;;  %v16_v16 = vrot.slane %v12_v8, %v15_v9  ;;  %v35_v18 = vrot.slane %v12_v8, %v34_v11  ;;  %vm75_vm0 = vcmp.eq.s32.totalorder %v74_v37, 0 }
   0x8   :  { %v45_v19 = vrot.slane %v12_v8, %v44_v13  ;;  %v55_v20 = vrot.slane %v12_v8, %v54_v15  ;;  %v69_v32 = vrot.slane %v12_v8, %v68_v25  ;;  %v62_v33 = vrot.slane %v12_v8, %v61_v29 }
   0x9   :  { %v80_v39 = vrot.slane %v12_v8, %v79_v38 }
   0xb   :  { %118 = vset.pattern.permute.xlu0 %v126_v4 }
  0x7d   :  { %v20_v12 = vpop.permute.xlu0 %19  ;;  %v40_v14 = vpop.permute.xlu1 %39 }
  0x7e   :  { %v26_v17 = vmul.f32 %v25_v10, %v20_v12  ;;  %v46_v26 = vmul.f32 %v45_v19, %v40_v14 }
  0x80   :  { %v27_v23 = vadd.f32 %v26_v17, %v16_v16 }
  0x82   :  { %v30_v21 = vpop.permute.xlu0 %29  ;;  %v50_v22 = vpop.permute.xlu1 %49 }
  0x83   :  { %v36_v24 = vmul.f32 %v35_v18, %v30_v21  ;;  %v56_v28 = vmul.f32 %v55_v20, %v50_v22 }
  0x85   :  { %v37_v27 = vadd.f32 %v36_v24, %v27_v23 }
  0x87   :  { %v47_v30 = vadd.f32 %v46_v26, %v37_v27 }
  0x89   :  { %v57_v31 = vadd.f32 %v56_v28, %v47_v30 }
  0x8b   :  { %v58_v34 = vmax.f32 %v57_v31, 0.0 }
  0x8d   :  { %v70_v35 = vmul.f32 %v69_v32, %v58_v34  ;;  %v63_v36 = vmul.f32 %v62_v33, %v58_v34 }
  0x8f   :  { %71 = vadd.xlane.f32.xlu0 %v70_v35  ;;  %64 = vadd.xlane.f32.xlu1 %v63_v36 }
 0x118   :  { %v72_v40 = vpop.xlane.xlu0 %71  ;;  %v65_v41 = vpop.xlane.xlu1 %64 }
 0x119   :  { %v76_v42 = vsel %vm75_vm0, %v65_v41, %v72_v40 }
 0x11a   :  { %v81_v43 = vadd.f32 %v80_v39, %v76_v42 }
 0x11c   :  { %v83_v44 = vsel %vm82_vm1, %v81_v43, -inf }
 0x11d   :  { %v84_v45 = vrot.slane %v83_v44, 4 }
 0x11f   :  { %v85_v46 = vmax.f32 %v83_v44, %v84_v45 }
 0x121   :  { %v86_v47 = vrot.slane %v85_v46, 2 }
 0x123   :  { %v87_v48 = vmax.f32 %v85_v46, %v86_v47 }
 0x125   :  { %v88_v49 = vrot.slane %v87_v48, 1 }
 0x127   :  { %v89_v50 = vmax.f32 %v87_v48, %v88_v49 }
 0x129   :  { %v90_v51 = vsub.f32 %v81_v43, %v89_v50 }
 0x12b   :  { %v91_v52 = vmul.f32 1.442695, %v90_v51 }
 0x12d   :  { %119 = vpow2.f32 %v91_v52 }
 0x13a   :  { %v120_v53 = vpop.eup %119 }
 0x13b   :  { %v93_v54 = vsel %vm82_vm1, %v120_v53, 0.0 }
 0x13c   :  { %v94_v55 = vrot.slane %v93_v54, 4 }
 0x13e   :  { %v95_v56 = vadd.f32 %v94_v55, %v93_v54 }
 0x140   :  { %v96_v57 = vrot.slane %v95_v56, 2 }
 0x142   :  { %v97_v58 = vadd.f32 %v96_v57, %v95_v56 }
 0x144   :  { %v98_v59 = vrot.slane %v97_v58, 1 }
 0x146   :  { %v99_v60 = vadd.f32 %v98_v59, %v97_v58 }
 0x148   :  { %121 = vrcp.f32 %v99_v60 }
 0x155   :  { %v122_v61 = vpop.eup %121 }
 0x156   :  { %v101_v62 = vmul.f32 %v122_v61, %v99_v60 }
 0x158   :  { %v102_v63 = vsub.f32 2.0, %v101_v62 }
 0x15a   :  { %v103_v0 = vmul.f32 %v122_v61, %v102_v63 }
 0x15c   :  { %v104_v1 = vmul.f32 %v120_v53, %v103_v0 }
 0x15e   :  { %105 = vst.msk [vmem:[%s156_s2] sm:$0xff] %vm82_vm1, %v104_v1 }

</bundles_post_ra>
